<compile_context>
chip_gen: v5e
topology: v5e:2x2
jax: 0.10.0
libtpu: 0.0.40
codegen_flags: <defaults>
</compile_context>

<pallas_src>
import jax
import jax.numpy as jnp
from jax.experimental import pallas as pl
from jax.experimental.pallas import tpu as pltpu

_CHUNK = 2048   # lanes per in-kernel compute chunk (16 vreg columns)
_LANE = 128


def _round_up(a, m):
    return ((a + m - 1) // m) * m


def _out_block_kernel(x_ref, w_ref, b_ref, o_ref):
    # x_ref: (n_blk, Cin, T)   w_ref: (Cout, Cin)   b_ref: (Cout, 1)
    # o_ref: (n_blk, Cout, T)
    n_blk, cin, t = x_ref.shape
    cout = o_ref.shape[1]

    w = w_ref[...].astype(jnp.float32)       # (Cout, Cin)  tiny, stays resident
    bias = b_ref[...].astype(jnp.float32)    # (Cout, 1)

    # Static chunking over the lane axis: keeps live intermediates to a few
    # vregs and writes each chunk straight back to o_ref.
    ch = t if t <= _CHUNK else _CHUNK
    n_full = t // ch
    rem = t - n_full * ch

    def emit(b, start, size):
        # All-static slices: channels on sublanes, `size` lanes wide.
        x = x_ref[b, :, start:start + size].astype(jnp.float32)   # (Cin, size)
        acc = jnp.broadcast_to(bias, (cout, size))
        # Cin is a tiny static int -> unrolls into pure VPU broadcast-FMAs
        # (no MXU push/pop latency for a K=4 matmul).
        for ci in range(cin):
            acc = acc + w[:, ci:ci + 1] * x[ci:ci + 1, :]          # (Cout,1)*(1,size)
        o_ref[b, :, start:start + size] = acc.astype(o_ref.dtype)

    for b in range(n_blk):
        for c in range(n_full):
            emit(b, c * ch, ch)
        if rem:
            emit(b, n_full * ch, rem)


def unet_out_block_apply(x_nchw, weight, bias, *,
                         t_sp_max=65536, t_sp_floor=4096, min_grid_steps=8):
    """Forward of UnetOutBlock (Conv{2,3}d, kernel_size=1, stride=1, bias=True).

    Args:
      x_nchw: (N, Cin, *spatial) float32   (2D or 3D spatial)
      weight: (Cout, Cin, 1[, 1, 1]) float32  -- PyTorch conv weight layout
      bias:   (Cout,) float32
    Returns:
      (N, Cout, *spatial) float32
    """
    N, Cin = x_nchw.shape[0], x_nchw.shape[1]
    spatial = tuple(x_nchw.shape[2:])
    HW = 1
    for s in spatial:
        HW *= s
    Cout = weight.shape[0]

    # Free, layout-preserving reshapes (NCHW stays native; no transposes).
    x = x_nchw.reshape(N, Cin, HW)
    w = weight.reshape(Cout, Cin)
    b = bias.reshape(Cout, 1)

    if HW > t_sp_max:
        # Large spatial: tile the lane axis; one image per block.
        n_blk = 1
        t_sp = t_sp_max      # multiple of _CHUNK; Pallas masks the ragged tail
        # Keep enough grid steps to feed both TensorCores on v7x.
        while t_sp > t_sp_floor and N * pl.cdiv(HW, t_sp) < min_grid_steps:
            t_sp //= 2       # stays a multiple of _CHUNK (power-of-two ladder)
    else:
        # Small spatial: whole spatial extent per block (always a legal block);
        # batch images so each step still moves ~t_sp_max lanes of HBM traffic.
        t_sp = HW
        hw_pad = _round_up(max(HW, 1), _LANE)   # padded lane footprint per image
        n_blk = max(1, min(N, 128, t_sp_max // hw_pad))
        if pl.cdiv(N, n_blk) < min_grid_steps:
            n_blk = max(1, pl.cdiv(N, min_grid_steps))

    grid = (pl.cdiv(N, n_blk), pl.cdiv(HW, t_sp))

    cost = pl.CostEstimate(
        flops=N * HW * Cout * (2 * Cin + 1),
        transcendentals=0,
        bytes_accessed=4 * (N * HW * Cin + N * HW * Cout + Cout * Cin + Cout),
    )

    out = pl.pallas_call(
        _out_block_kernel,
        out_shape=jax.ShapeDtypeStruct((N, Cout, HW), x_nchw.dtype),
        grid_spec=pltpu.PrefetchScalarGridSpec(
            num_scalar_prefetch=0,
            grid=grid,
            in_specs=[
                pl.BlockSpec((n_blk, Cin, t_sp), lambda n, s: (n, 0, s)),  # x
                pl.BlockSpec((Cout, Cin), lambda n, s: (0, 0)),            # weight
                pl.BlockSpec((Cout, 1), lambda n, s: (0, 0)),              # bias
            ],
            out_specs=pl.BlockSpec((n_blk, Cout, t_sp), lambda n, s: (n, 0, s)),
        ),
        compiler_params=pltpu.CompilerParams(
            dimension_semantics=("parallel", "parallel")),
        cost_estimate=cost,
    )(x, w, b)

    return out.reshape((N, Cout) + spatial)


if __name__ == "__main__":
    # Small shapes consistent with UnetOutBlock(spatial_dims=2, in=4, out=8)
    N, Cin, H, W = 2, 4, 16, 16
    Cout = 8

    key = jax.random.PRNGKey(0)
    kx, kw, kb = jax.random.split(key, 3)

    x = jax.random.normal(kx, (N, Cin, H, W), dtype=jnp.float32)
    # Same parameter shapes nn.Conv2d(4, 8, kernel_size=1, bias=True) has.
    weight = jax.random.normal(kw, (Cout, Cin, 1, 1), dtype=jnp.float32) * 0.1
    bias = jax.random.normal(kb, (Cout,), dtype=jnp.float32) * 0.1

    out = unet_out_block_apply(x, weight, bias)
    out = jax.block_until_ready(out)

    # Reference check in plain JAX (same semantics as PyTorch 1x1 conv + bias).
    ref = jnp.einsum("nchw,oc->nohw", x, weight.reshape(Cout, Cin)) \
        + bias[None, :, None, None]
    assert out.shape == (N, Cout, H, W)
    assert jnp.allclose(out, ref, atol=1e-5, rtol=1e-5)

    print("KERNEL_OK")
</pallas_src>

<mosaic_0001>
module attributes {stable_mosaic.version = 11 : i64} {
  func.func @_out_block_kernel(%arg0: i32, %arg1: i32, %arg2: memref<1x4x256xf32, #tpu.memory_space<vmem>>, %arg3: memref<8x4xf32, #tpu.memory_space<vmem>>, %arg4: memref<8x1xf32, #tpu.memory_space<vmem>>, %arg5: memref<1x8x256xf32, #tpu.memory_space<vmem>>) attributes {dimension_semantics = [#tpu.dimension_semantics<parallel>, #tpu.dimension_semantics<parallel>], iteration_bounds = array<i64: 2, 1>, scalar_prefetch = 0 : i64, scratch_operands = 0 : i64, tpu.core_type = #tpu.core_type<tc>, window_params = [{transform_indices = @transform_0, window_bounds = array<i64: 1, 4, 256>}, {pipeline_mode = #tpu.pipeline_mode<synchronous>, transform_indices = @transform_1, window_bounds = array<i64: 8, 4>}, {pipeline_mode = #tpu.pipeline_mode<synchronous>, transform_indices = @transform_2, window_bounds = array<i64: 8, 1>}, {transform_indices = @transform_3, window_bounds = array<i64: 1, 8, 256>}]} {
    %c0 = arith.constant 0 : index
    %c0_0 = arith.constant 0 : index
    %0 = vector.load %arg3[%c0, %c0_0] : memref<8x4xf32, #tpu.memory_space<vmem>>, vector<8x4xf32>
    %c0_1 = arith.constant 0 : index
    %c0_2 = arith.constant 0 : index
    %1 = vector.load %arg4[%c0_1, %c0_2] : memref<8x1xf32, #tpu.memory_space<vmem>>, vector<8x1xf32>
    %c0_3 = arith.constant 0 : index
    %c0_4 = arith.constant 0 : index
    %c0_5 = arith.constant 0 : index
    %2 = vector.load %arg2[%c0_3, %c0_4, %c0_5] : memref<1x4x256xf32, #tpu.memory_space<vmem>>, vector<1x4x256xf32>
    %3 = vector.shape_cast %2 : vector<1x4x256xf32> to vector<4x256xf32>
    %4 = vector.shape_cast %1 : vector<8x1xf32> to vector<8x1xf32>
    %5 = vector.broadcast %4 : vector<8x1xf32> to vector<8x256xf32>
    %6 = vector.extract_strided_slice %0 {offsets = [0, 0], sizes = [8, 1], strides = [1, 1]} : vector<8x4xf32> to vector<8x1xf32>
    %7 = vector.extract_strided_slice %3 {offsets = [0, 0], sizes = [1, 256], strides = [1, 1]} : vector<4x256xf32> to vector<1x256xf32>
    %8 = vector.broadcast %6 : vector<8x1xf32> to vector<8x256xf32>
    %9 = vector.broadcast %7 : vector<1x256xf32> to vector<8x256xf32>
    %10 = arith.mulf %8, %9 : vector<8x256xf32>
    %11 = arith.addf %5, %10 : vector<8x256xf32>
    %12 = vector.extract_strided_slice %0 {offsets = [0, 1], sizes = [8, 1], strides = [1, 1]} : vector<8x4xf32> to vector<8x1xf32>
    %13 = vector.extract_strided_slice %3 {offsets = [1, 0], sizes = [1, 256], strides = [1, 1]} : vector<4x256xf32> to vector<1x256xf32>
    %14 = vector.broadcast %12 : vector<8x1xf32> to vector<8x256xf32>
    %15 = vector.broadcast %13 : vector<1x256xf32> to vector<8x256xf32>
    %16 = arith.mulf %14, %15 : vector<8x256xf32>
    %17 = arith.addf %11, %16 : vector<8x256xf32>
    %18 = vector.extract_strided_slice %0 {offsets = [0, 2], sizes = [8, 1], strides = [1, 1]} : vector<8x4xf32> to vector<8x1xf32>
    %19 = vector.extract_strided_slice %3 {offsets = [2, 0], sizes = [1, 256], strides = [1, 1]} : vector<4x256xf32> to vector<1x256xf32>
    %20 = vector.broadcast %18 : vector<8x1xf32> to vector<8x256xf32>
    %21 = vector.broadcast %19 : vector<1x256xf32> to vector<8x256xf32>
    %22 = arith.mulf %20, %21 : vector<8x256xf32>
    %23 = arith.addf %17, %22 : vector<8x256xf32>
    %24 = vector.extract_strided_slice %0 {offsets = [0, 3], sizes = [8, 1], strides = [1, 1]} : vector<8x4xf32> to vector<8x1xf32>
    %25 = vector.extract_strided_slice %3 {offsets = [3, 0], sizes = [1, 256], strides = [1, 1]} : vector<4x256xf32> to vector<1x256xf32>
    %26 = vector.broadcast %24 : vector<8x1xf32> to vector<8x256xf32>
    %27 = vector.broadcast %25 : vector<1x256xf32> to vector<8x256xf32>
    %28 = arith.mulf %26, %27 : vector<8x256xf32>
    %29 = arith.addf %23, %28 : vector<8x256xf32>
    %c0_6 = arith.constant 0 : index
    %c0_7 = arith.constant 0 : index
    %c0_8 = arith.constant 0 : index
    %30 = vector.load %arg5[%c0_6, %c0_7, %c0_8] : memref<1x8x256xf32, #tpu.memory_space<vmem>>, vector<1x8x256xf32>
    %31 = vector.shape_cast %30 : vector<1x8x256xf32> to vector<8x256xf32>
    %32 = vector.shape_cast %29 : vector<8x256xf32> to vector<1x8x256xf32>
    tpu.vector_store %arg5[%c0_6, %c0_7, %c0_8], %32 {strides = array<i32>} : memref<1x8x256xf32, #tpu.memory_space<vmem>>, vector<1x8x256xf32>,
    return
  }
  func.func @transform_0(%arg0: i32, %arg1: i32) -> (i32, i32, i32) {
    %c0_i32 = arith.constant 0 : i32
    %c0_i32_0 = arith.constant 0 : i32
    return %arg0, %c0_i32, %arg1 : i32, i32, i32
  }
  func.func @transform_1(%arg0: i32, %arg1: i32) -> (i32, i32) {
    %c0_i32 = arith.constant 0 : i32
    %c0_i32_0 = arith.constant 0 : i32
    %c0_i32_1 = arith.constant 0 : i32
    return %c0_i32, %c0_i32_0 : i32, i32
  }
  func.func @transform_2(%arg0: i32, %arg1: i32) -> (i32, i32) {
    %c0_i32 = arith.constant 0 : i32
    %c0_i32_0 = arith.constant 0 : i32
    %c0_i32_1 = arith.constant 0 : i32
    return %c0_i32, %c0_i32_0 : i32, i32
  }
  func.func @transform_3(%arg0: i32, %arg1: i32) -> (i32, i32, i32) {
    %c0_i32 = arith.constant 0 : i32
    %c0_i32_0 = arith.constant 0 : i32
    return %arg0, %c0_i32, %arg1 : i32, i32, i32
  }
}

</mosaic_0001>

<bundles_post_ra>
// kernel: tpu_custom_call.1
= control target key start
LH: loop header
LB: loop body
LE: loop exit
PB: predicated region body
PF: predicated region fallthrough
CT: control target
= control target key end

     0   :  { %8 = vsyncpa [#allocation3], 0  ;;  %s653_s0 = inlined_call_operand.vmem [shape: f32[2,4,256], index: 0, kind: input, shape index: {}]   ;;  %s654_s1 = inlined_call_operand.vmem [shape: f32[8,4], index: 1, kind: input, shape index: {}]   ;;  %s655_s2 = inlined_call_operand.vmem [shape: f32[8,1], index: 2, kind: input, shape index: {}]   ;;  %s656_s3 = inlined_call_operand.hbm [shape: f32[2,8,256], index: 3, kind: output, shape index: {}]  }
   0x1   :  { %10 = vsyncpa [#allocation3 + $0x1], 0  ;;  %s546_s12 = smov 0   ;;  %s548_s13 = smov 0  }
   0x2   :  { %s550_s14 = smov 0   ;;  %s552_s15 = smov 0  }
   0x3   :  { %s554_s16 = smov 0   ;;  %s556_s17 = smov 0  }
   0x4 LB: > { %s363_s18 = sadd.s32 4294967295, %s520_s17   ;;  %s364_s19 = sadd.s32 4294967294, %s520_s17   ;;  %s520_s17 = sphi %s556_s17, %s16_s17   ;;  %s516_s16 = sphi %s554_s16, %s663_s16   ;;  %s512_s15 = sphi %s552_s15, %s662_s15   ;;  %s508_s14 = sphi %s550_s14, %s661_s14   ;;  %s504_s13 = sphi %s548_s13, %s660_s13   ;;  %s500_s12 = sphi %s546_s12, %s659_s12  }
   0x5   : > { %s28_s20 = sadd.s32 1, %s516_s16  ;;  %s107_s21 = sadd.s32 1, %s508_s14 }
   0x6   : > { %p30_p0 = scmp.ge.s32.totalorder %s28_s20, 2  ;;  %p117_p1 = scmp.ne.s32.totalorder %s508_s14, %s504_s13 }
   0x7   : > { %p118_p2 = scmp.eq.s32.totalorder %s363_s18, 1  ;;  %p123_p3 = scmp.ne.s32.totalorder %s504_s13, %s500_s12 }
   0x8   : > { %s665_s20 = smov (%p30_p0, %s28_s20), 0  ;;  %p124_p5 = scmp.eq.s32.totalorder %s364_s19, 1 }
   0x9   : > { %p586_p4 = por %p118_p2, %p117_p1  ;;  %s102_s23 = ssub.s32 %s516_s16, %s665_s20 }
   0xa   : > { %p367_p6 = scmp.ge.s32.totalorder %s520_s17, 1  ;;  %p105_p7 = scmp.eq.s32.totalorder %s102_s23, 0 }
   0xb   : > { %p593_p8 = por %p124_p5, %p123_p3  ;;  %p161_p9 = scmp.lt.s32.totalorder %s520_s17, 3 }
   0xc   : > { %s599_s25 = scalar_select %p105_p7, %s508_s14, %s107_s21  }
   0xd   : > { %p162_p10 = pnand %p367_p6, %p161_p9 }
   0xe   : > { %p190_p11 = scmp.lt.s32.totalorder (!%p162_p10), %s512_s15, 1  ;;  %s186_s8 = sand.u32 (!%p162_p10), 1, %s504_s13  }
   0xf   : > { %165 = sbr.rel (%p162_p10) target bundleno = 157 (0x9d), region = 32  ;;  %s368_s9 = sshll.u32 (!%p162_p10), %s186_s8, 4 }
  0x10   : > { %s377_s10 = sshll.u32 (!%p162_p10), %s512_s15, 4  ;;  %s269_s26 = scalar_lea.sflag (!%p162_p10), [#allocation3], %s186_s8 }
  0x11   : > { %s282_s19 = scalar_lea.hbm (!%p162_p10), %s656_s3, %s377_s10 }
  0x12   : > { %s286_s23 = sshll.u32 (!%p162_p10), %s282_s19, 4  ;;  %s287_s23 = int_to_ptr.hbm [resolvable:$true] %s286_s23 }
  0x13   : > { %s456_s27 = sshra.s32 (!%p162_p10), %s287_s23, 4  ;;  %s457_s27 = int_to_ptr.hbm [resolvable:$true] %s456_s27 }
  0x14   : > { %v200_v0 = vld [vmem:[%s654_s1] sm:$0xff]  ;;  %v522_v1 = vmov 0   ;;  %v523_v2 = vmov 1   ;;  %v524_v3 = vmov 3   ;;  %v525_v5 = vmov 2   ;;  %s191_s30 = scalar_select %p190_p11, %s512_s15, 1 }
  0x15   : > { %437 = vset.pattern.permute.xlu0 %v522_v1  ;;  %438 = vset.pattern.permute.xlu1 %v523_v2  ;;  %v201_v4 = vld [vmem:[%s655_s2] sm:$0xff]  ;;  %s188_s15 = scalar_lea.vmem [#allocation2], %s368_s9  ;;  %s458_s28 = scalar_lea.hbm %s457_s27, 16 }
  0x16   : > { %210 = vperm.xlu0 %437, %v200_v0   ;;  %225 = vperm.xlu1 %438, %v200_v0   ;;  %s376_s4 = sshll.u32 %s191_s30, 3  ;;  %s284_s21 = sshll.u32 %s188_s15, 4  ;;  %s285_s21 = int_to_ptr.vmem [resolvable:$true] %s284_s21 }
  0x17   : > { %440 = vset.pattern.permute.xlu2 %v524_v3  ;;  %s197_s7 = scalar_lea.vmem %s653_s0, %s376_s4  ;;  %p459_p12 = scmp.ne.s32.totalorder %s457_s27, %s458_s28 }
  0x18   : > { %253 = vperm.xlu2 %440, %v200_v0   ;;  %v202_v6 = vld [vmem:[%s197_s7] sm:$0xff]  ;;  %s462_s4 = scalar_lea.hbm %s656_s3, 32  ;;  %p463_p1 = scmp.lt.s32.totalorder %s457_s27, %s656_s3 }
  0x19   : > { %v214_v7 = vperm.slane %v202_v6, 0  ;;  %v215_v8 = vperm.slane %v202_v6, 4  ;;  %v228_v11 = vperm.slane %v202_v6, 1  ;;  %v229_v12 = vperm.slane %v202_v6, 5  ;;  %p460_p13 = pnand %p459_p12, %p586_p4  ;;  %p464_p2 = scmp.lt.s32.totalorder %s462_s4, %s458_s28 }
  0x1a   : > { %v242_v13 = vperm.slane %v202_v6, 2  ;;  %v243_v14 = vperm.slane %v202_v6, 6  ;;  %v256_v17 = vperm.slane %v202_v6, 3  ;;  %v257_v18 = vperm.slane %v202_v6, 7 }
  0x1b   : > { %v218_v15 = vperm.slane %v214_v7, 0  ;;  %v219_v16 = vperm.slane %v215_v8, 0  ;;  %v232_v19 = vperm.slane %v228_v11, 1  ;;  %v233_v20 = vperm.slane %v229_v12, 1  ;;  %p461_p0 = pneg %p460_p13  ;;  %p465_p3 = por %p464_p2, %p463_p1 }
  0x1c   : > { %v246_v21 = vperm.slane %v242_v13, 2  ;;  %v247_v22 = vperm.slane %v243_v14, 2  ;;  %v260_v25 = vperm.slane %v256_v17, 3  ;;  %v261_v26 = vperm.slane %v257_v18, 3 }
  0x1d   : > { %p466_p5 = pnand %p465_p3, %p461_p0 }
  0x1e   : > { %205 = vperm.xlu0 %437, %v201_v4   ;;  %439 = vset.pattern.permute.xlu1 %v525_v5 }
  0x1f   : > { %239 = vperm.xlu1 %439, %v200_v0  }
  0x26   : > { %441 = vset.pattern.permute.xlu0 %v524_v3 }
  0x72   : > { %v254_v28 = vpop.permute.xlu2 %253 }
  0x73   : > { %v262_v38 = vmul.f32 %v260_v25, %v254_v28  ;;  %v263_v39 = vmul.f32 %v261_v26, %v254_v28 }
  0x88   : > { %v211_v9 = vpop.permute.xlu0 %210  ;;  %v226_v10 = vpop.permute.xlu1 %225 }
  0x89   : > { %v220_v23 = vmul.f32 %v218_v15, %v211_v9  ;;  %v221_v24 = vmul.f32 %v219_v16, %v211_v9  ;;  %v234_v29 = vmul.f32 %v232_v19, %v226_v10  ;;  %v235_v30 = vmul.f32 %v233_v20, %v226_v10 }
  0x90   : > { %v206_v27 = vpop.permute.xlu0 %205 }
  0x91   : > { %v222_v31 = vadd.f32 %v220_v23, %v206_v27  ;;  %v223_v32 = vadd.f32 %v221_v24, %v206_v27  ;;  %v240_v33 = vpop.permute.xlu1 %239 }
  0x92   : > { %v248_v34 = vmul.f32 %v246_v21, %v240_v33  ;;  %v249_v35 = vmul.f32 %v247_v22, %v240_v33 }
  0x93   : > { %v236_v36 = vadd.f32 %v234_v29, %v222_v31  ;;  %v237_v37 = vadd.f32 %v235_v30, %v223_v32 }
  0x95   : > { %v250_v40 = vadd.f32 %v248_v34, %v236_v36  ;;  %v251_v41 = vadd.f32 %v249_v35, %v237_v37 }
  0x97   : > { %v264_v42 = vadd.f32 %v262_v38, %v250_v40  ;;  %v265_v43 = vadd.f32 %v263_v39, %v251_v41 }
  0x99   : > { %266 = vst [vmem:[%s188_s15] sm:$0xff] %v264_v42 }
  0x9a   : > { %267 = vst [vmem:[%s188_s15 + $0x8] sm:$0xff] %v265_v43 }
  0x9b   : > { %469 = shalt.err (!%p466_p5)
}
  0x9c   : > { %378 = dma.vmem_to_hbm [thread:$0]  (%p586_p4), %s285_s21, 256, %s287_s23, %s269_s26  }
  0x9d PF: > { %p384_p6 = scmp.ge.s32.totalorder %s520_s17, 2  ;;  %s298_s7 = sand.u32 1, %s500_s12  }
  0x9e   : > { %s299_s8 = scalar_lea.sflag [#allocation3], %s298_s7 }
  0x9f   : > { %p381_p7 = pnand %p384_p6, %p593_p8 }
  0xa1   : > { %p382_p9 = pneg %p381_p7 }
  0xa3   : > { %495 = dma.done.wait (%p382_p9), %s299_s8, 256  }
  0xa4   : > { %497 = vsyncadd (%p382_p9), %s299_s8, 4294967040  ;;  %s16_s17 = sadd.s32 1, %s520_s17   ;;  %s659_s12 = smov %s504_s13 }
  0xa5   : > { %p13_p10 = scmp.ge.s32.totalorder %s16_s17, 4   ;;  %s660_s13 = smov %s508_s14 }
  0xa6   : > { %s661_s14 = smov %s599_s25  ;;  %s662_s15 = smov %s516_s16 }
  0xa7   : > { %s663_s16 = smov %s665_s20  ;;  %15 = sbr.rel (!%p13_p10) target bundleno = 4 (0x4), region = 67 }
  0xac   :  { %305 = vsyncpa [#allocation3], 1 }
  0xad   :  { %307 = vsyncpa [#allocation3 + $0x1], 1 }

</bundles_post_ra>
